<compile_context>
chip_gen: v5e
topology: v5e:2x2
jax: 0.10.0
libtpu: 0.0.40
codegen_flags: <defaults>
</compile_context>

<pallas_src>
import jax
import jax.numpy as jnp
from jax.experimental import pallas as pl
from jax.experimental.pallas import tpu as pltpu

IN_DIM = 135
HID_DIM = 110
OUT_DIM = 80

HID_PAD = 128   # lane-dense hidden width
OUT_PAD = 128   # lane-dense output width
ROW_TILE_MAX = 512


def _round_up(x, m):
    return (x + m - 1) // m * m


def _mlp_kernel(x_ref, w1_ref, b1_ref, w2_ref, b2_ref, o_ref):
    # x_ref block: (row_tile, IN_DIM); weights are pinned (constant index_map).
    x = x_ref[...]                                             # (rows, 135)
    h = jnp.dot(x, w1_ref[...], preferred_element_type=jnp.float32)
    h = jnp.maximum(h + b1_ref[...], 0.0)                      # (rows, 128), ReLU
    y = jnp.dot(h, w2_ref[...], preferred_element_type=jnp.float32)
    o_ref[...] = (y + b2_ref[...]).astype(o_ref.dtype)         # (rows, 128) unmasked store


def feature_extractor_pallas(x, w1, b1, w2, b2):
    """x: (B, S, 135) float32. w1: (135, 110), b1: (110,), w2: (110, 80), b2: (80,)
    (weights stored pre-transposed vs. PyTorch's (out, in) layout).
    Returns a stacked (B, S, 80) array (unstack per batch element outside if the
    original list-of-tensors interface is needed)."""
    B, S, _ = x.shape
    R = B * S

    # --- merged-row layout + row padding to a multiple-of-8 tile -------------
    row_tile = min(ROW_TILE_MAX, _round_up(R, 8))
    R_pad = _round_up(R, row_tile)
    x2d = x.reshape(R, IN_DIM)
    if R_pad != R:
        x2d = jnp.pad(x2d, ((0, R_pad - R), (0, 0)))

    # --- lane-dense (zero-padded) weights / biases ---------------------------
    w1p = jnp.pad(w1, ((0, 0), (0, HID_PAD - HID_DIM)))          # (135, 128)
    b1p = jnp.pad(b1, (0, HID_PAD - HID_DIM)).reshape(1, HID_PAD)
    w2p = jnp.pad(w2, ((0, HID_PAD - HID_DIM), (0, OUT_PAD - OUT_DIM)))  # (128, 128)
    b2p = jnp.pad(b2, (0, OUT_PAD - OUT_DIM)).reshape(1, OUT_PAD)

    grid = (R_pad // row_tile,)

    out = pl.pallas_call(
        _mlp_kernel,
        out_shape=jax.ShapeDtypeStruct((R_pad, OUT_PAD), x.dtype),
        grid_spec=pl.GridSpec(
            grid=grid,
            in_specs=[
                pl.BlockSpec((row_tile, IN_DIM), lambda i: (i, 0)),
                pl.BlockSpec((IN_DIM, HID_PAD), lambda i: (0, 0)),
                pl.BlockSpec((1, HID_PAD), lambda i: (0, 0)),
                pl.BlockSpec((HID_PAD, OUT_PAD), lambda i: (0, 0)),
                pl.BlockSpec((1, OUT_PAD), lambda i: (0, 0)),
            ],
            out_specs=pl.BlockSpec((row_tile, OUT_PAD), lambda i: (i, 0)),
        ),
        compiler_params=pltpu.CompilerParams(
            dimension_semantics=("parallel",)),
    )(x2d, w1p, b1p, w2p, b2p)

    # Drop row padding and the padded output lanes, restore (B, S, 80).
    return out[:R, :OUT_DIM].reshape(B, S, OUT_DIM)


def _init_params(key):
    # Deterministic init mimicking nn.Linear's uniform(-1/sqrt(fan_in), 1/sqrt(fan_in)).
    k1, k2, k3, k4 = jax.random.split(key, 4)
    bound1 = 1.0 / (IN_DIM ** 0.5)
    bound2 = 1.0 / (HID_DIM ** 0.5)
    # Stored as (in, out), i.e. transpose of PyTorch's (out, in) weight.
    w1 = jax.random.uniform(k1, (IN_DIM, HID_DIM), jnp.float32, -bound1, bound1)
    b1 = jax.random.uniform(k2, (HID_DIM,), jnp.float32, -bound1, bound1)
    w2 = jax.random.uniform(k3, (HID_DIM, OUT_DIM), jnp.float32, -bound2, bound2)
    b2 = jax.random.uniform(k4, (OUT_DIM,), jnp.float32, -bound2, bound2)
    return w1, b1, w2, b2


if __name__ == "__main__":
    key = jax.random.PRNGKey(0)
    kp, kx = jax.random.split(key)
    w1, b1, w2, b2 = _init_params(kp)

    B, S = 2, 8  # args.batch_size = 2, per-element input is (seq=8, 135)
    x = jax.random.normal(kx, (B, S, IN_DIM), jnp.float32)

    out = jax.block_until_ready(feature_extractor_pallas(x, w1, b1, w2, b2))

    # PyTorch forward returns a Python list (one tensor per batch element);
    # unstacking happens outside the kernel / jit path.
    feats = [out[i] for i in range(B)]

    # Pure-JAX reference check
    ref = [jnp.maximum(x[i] @ w1 + b1, 0.0) @ w2 + b2 for i in range(B)]
    for f, r in zip(feats, ref):
        assert f.shape == (S, OUT_DIM)
        assert jnp.allclose(f, r, atol=1e-4, rtol=1e-4)

    print("KERNEL_OK")
</pallas_src>

<mosaic_0001>
module attributes {stable_mosaic.version = 11 : i64} {
  func.func @_mlp_kernel(%arg0: i32, %arg1: memref<16x135xf32, #tpu.memory_space<vmem>>, %arg2: memref<135x128xf32, #tpu.memory_space<vmem>>, %arg3: memref<1x128xf32, #tpu.memory_space<vmem>>, %arg4: memref<128x128xf32, #tpu.memory_space<vmem>>, %arg5: memref<1x128xf32, #tpu.memory_space<vmem>>, %arg6: memref<16x128xf32, #tpu.memory_space<vmem>>) attributes {dimension_semantics = [#tpu.dimension_semantics<parallel>], iteration_bounds = array<i64: 1>, scalar_prefetch = 0 : i64, scratch_operands = 0 : i64, tpu.core_type = #tpu.core_type<tc>, window_params = [{transform_indices = @transform_0, window_bounds = array<i64: 16, 135>}, {pipeline_mode = #tpu.pipeline_mode<synchronous>, transform_indices = @transform_1, window_bounds = array<i64: 135, 128>}, {pipeline_mode = #tpu.pipeline_mode<synchronous>, transform_indices = @transform_2, window_bounds = array<i64: 1, 128>}, {pipeline_mode = #tpu.pipeline_mode<synchronous>, transform_indices = @transform_3, window_bounds = array<i64: 128, 128>}, {pipeline_mode = #tpu.pipeline_mode<synchronous>, transform_indices = @transform_4, window_bounds = array<i64: 1, 128>}, {transform_indices = @transform_5, window_bounds = array<i64: 16, 128>}]} {
    %c0 = arith.constant 0 : index
    %c0_0 = arith.constant 0 : index
    %0 = vector.load %arg1[%c0, %c0_0] : memref<16x135xf32, #tpu.memory_space<vmem>>, vector<16x135xf32>
    %c0_1 = arith.constant 0 : index
    %c0_2 = arith.constant 0 : index
    %1 = vector.load %arg2[%c0_1, %c0_2] : memref<135x128xf32, #tpu.memory_space<vmem>>, vector<135x128xf32>
    %cst = arith.constant dense<0.000000e+00> : vector<16x128xf32>
    %2 = tpu.matmul %0, %1, %cst {dimension_numbers = #tpu.dot_dimension_numbers<[1], [0], [0], [1], [0, 0, 1, 1], [], []>} : vector<16x135xf32>, vector<135x128xf32>, vector<16x128xf32> -> vector<16x128xf32>
    %c0_3 = arith.constant 0 : index
    %c0_4 = arith.constant 0 : index
    %3 = vector.load %arg3[%c0_3, %c0_4] : memref<1x128xf32, #tpu.memory_space<vmem>>, vector<1x128xf32>
    %4 = vector.broadcast %3 : vector<1x128xf32> to vector<16x128xf32>
    %5 = arith.addf %2, %4 : vector<16x128xf32>
    %cst_5 = arith.constant 0.000000e+00 : f32
    %6 = vector.broadcast %cst_5 : f32 to vector<16x128xf32>
    %7 = arith.maximumf %5, %6 : vector<16x128xf32>
    %c0_6 = arith.constant 0 : index
    %c0_7 = arith.constant 0 : index
    %8 = vector.load %arg4[%c0_6, %c0_7] : memref<128x128xf32, #tpu.memory_space<vmem>>, vector<128x128xf32>
    %cst_8 = arith.constant dense<0.000000e+00> : vector<16x128xf32>
    %9 = tpu.matmul %7, %8, %cst_8 {dimension_numbers = #tpu.dot_dimension_numbers<[1], [0], [0], [1], [0, 0, 1, 1], [], []>} : vector<16x128xf32>, vector<128x128xf32>, vector<16x128xf32> -> vector<16x128xf32>
    %c0_9 = arith.constant 0 : index
    %c0_10 = arith.constant 0 : index
    %10 = vector.load %arg5[%c0_9, %c0_10] : memref<1x128xf32, #tpu.memory_space<vmem>>, vector<1x128xf32>
    %11 = vector.broadcast %10 : vector<1x128xf32> to vector<16x128xf32>
    %12 = arith.addf %9, %11 : vector<16x128xf32>
    %c0_11 = arith.constant 0 : index
    %c0_12 = arith.constant 0 : index
    %13 = vector.load %arg6[%c0_11, %c0_12] : memref<16x128xf32, #tpu.memory_space<vmem>>, vector<16x128xf32>
    tpu.vector_store %arg6[%c0_11, %c0_12], %12 {strides = array<i32>} : memref<16x128xf32, #tpu.memory_space<vmem>>, vector<16x128xf32>,
    return
  }
  func.func @transform_0(%arg0: i32) -> (i32, i32) {
    %c0_i32 = arith.constant 0 : i32
    %c0_i32_0 = arith.constant 0 : i32
    return %arg0, %c0_i32 : i32, i32
  }
  func.func @transform_1(%arg0: i32) -> (i32, i32) {
    %c0_i32 = arith.constant 0 : i32
    %c0_i32_0 = arith.constant 0 : i32
    %c0_i32_1 = arith.constant 0 : i32
    return %c0_i32, %c0_i32_0 : i32, i32
  }
  func.func @transform_2(%arg0: i32) -> (i32, i32) {
    %c0_i32 = arith.constant 0 : i32
    %c0_i32_0 = arith.constant 0 : i32
    %c0_i32_1 = arith.constant 0 : i32
    return %c0_i32, %c0_i32_0 : i32, i32
  }
  func.func @transform_3(%arg0: i32) -> (i32, i32) {
    %c0_i32 = arith.constant 0 : i32
    %c0_i32_0 = arith.constant 0 : i32
    %c0_i32_1 = arith.constant 0 : i32
    return %c0_i32, %c0_i32_0 : i32, i32
  }
  func.func @transform_4(%arg0: i32) -> (i32, i32) {
    %c0_i32 = arith.constant 0 : i32
    %c0_i32_0 = arith.constant 0 : i32
    %c0_i32_1 = arith.constant 0 : i32
    return %c0_i32, %c0_i32_0 : i32, i32
  }
  func.func @transform_5(%arg0: i32) -> (i32, i32) {
    %c0_i32 = arith.constant 0 : i32
    %c0_i32_0 = arith.constant 0 : i32
    return %arg0, %c0_i32 : i32, i32
  }
}

</mosaic_0001>

<bundles_post_ra>
// kernel: tpu_custom_call.1
= control target key start
LH: loop header
LB: loop body
LE: loop exit
PB: predicated region body
PF: predicated region fallthrough
CT: control target
= control target key end

     0   :  { %10 = vsyncpa [#allocation3], 0  ;;  %s431_s0 = inlined_call_operand.hbm [shape: f32[16,135], index: 0, kind: input, shape index: {}]   ;;  %s432_s1 = inlined_call_operand.hbm [shape: f32[135,128], index: 1, kind: input, shape index: {}]   ;;  %s433_s2 = inlined_call_operand.vmem [shape: f32[1,128], index: 2, kind: input, shape index: {}]   ;;  %s434_s3 = inlined_call_operand.hbm [shape: f32[128,128], index: 3, kind: input, shape index: {}]   ;;  %s435_s4 = inlined_call_operand.vmem [shape: f32[1,128], index: 4, kind: input, shape index: {}]   ;;  %s436_s5 = inlined_call_operand.hbm [shape: f32[16,128], index: 5, kind: output, shape index: {}]  }
   0x1   :  { %11 = vsyncpa [#allocation6], 0  ;;  %s30_s20 = sshll.u32 %s432_s1, 4  ;;  %s31_s20 = int_to_ptr.hbm [resolvable:$true] %s30_s20 }
   0x2   :  { %12 = vsyncpa [#allocation4], 0  ;;  %s364_s21 = smov [#allocation5]   ;;  %s17_s25 = sshll.u32 %s431_s0, 4  ;;  %s18_s25 = int_to_ptr.hbm [resolvable:$true] %s17_s25 }
   0x3   :  { %s32_s22 = sshll.u32 %s364_s21, 4  ;;  %s365_s26 = smov 128   ;;  %s33_s22 = int_to_ptr.vmem [resolvable:$true] %s32_s22 }
   0x4   :  { %s366_s27 = smov 8   ;;  %s367_s28 = smov [#allocation2]  }
   0x5   :  { %38 = dma.hbm_to_vmem [thread:$0]  %s31_s20, 2176, %s33_s22, [#allocation6], %s365_s26, %s365_s26, %s366_s27  }
   0x6   :  { %s19_s29 = sshll.u32 %s367_s28, 4  ;;  %s368_s1 = smov 256   ;;  %s20_s29 = int_to_ptr.vmem [resolvable:$true] %s19_s29 }
   0x7   :  { %s369_s30 = smov 16   ;;  %s45_s8 = sshll.u32 %s434_s3, 4  ;;  %s46_s8 = int_to_ptr.hbm [resolvable:$true] %s45_s8 }
   0x8   :  { %25 = dma.hbm_to_vmem [thread:$0]  %s18_s25, 512, %s20_s29, [#allocation3], %s368_s1, %s368_s1, %s369_s30  }
   0x9   :  { %s370_s9 = smov [#allocation7]  }
   0xa   :  { %s47_s0 = sshll.u32 %s370_s9, 4  ;;  %s48_s0 = int_to_ptr.vmem [resolvable:$true] %s47_s0 }
   0xb   :  { %53 = dma.hbm_to_vmem [thread:$0]  %s46_s8, 2048, %s48_s0, [#allocation6], %s365_s26, %s365_s26, %s366_s27  }
   0xc   :  { %358 = dma.done.wait [#allocation3], 512  }
   0xd   :  { %359 = vsyncadd [#allocation3], 4294966784 }
   0xe   :  { %360 = dma.done.wait [#allocation6], 4224  }
   0xf   :  { %361 = vsyncadd [#allocation6], 4294963072  ;;  %v87_v0 = vld [vmem:[#allocation5 + $0x78] sm:$0xff]  ;;  %v86_v1 = vld [vmem:[#allocation5 + $0x70] sm:$0xff]  ;;  %vm100_vm0 = vcmask 1046528   ;;  %vm93_vm1 = vcmask 56320  }
  0x10   :  { %104 = vmatpush.msra.mxu0 %v87_v0  ;;  %220 = vmatpush.msra.mxu3 %v87_v0  ;;  %v85_v2 = vld [vmem:[#allocation5 + $0x68] sm:$0xff]  ;;  %v84_v3 = vld [vmem:[#allocation5 + $0x60] sm:$0xff]  ;;  %v83_v5 = vld [vmem:[#allocation5 + $0x58] sm:$0xff]  ;;  %s371_s13 = smov [#allocation8]   ;;  %s203_s16 = sshll.u32 %s436_s5, 4  ;;  %s204_s16 = int_to_ptr.hbm [resolvable:$true] %s203_s16 }
  0x11   :  { %v88_v4 = vld [vmem:[#allocation5 + $0x80] sm:$0x7f]  ;;  %v69_v6 = vld [vmem:[#allocation2 + $0x8] sm:$0xff]  ;;  %v82_v8 = vld [vmem:[#allocation5 + $0x50] sm:$0xff] }
  0x12   :  { %105 = vmatpush.msra.mxu0 %v86_v1  ;;  %221 = vmatpush.msra.mxu3 %v86_v1  ;;  %v167_v7 = vld [vmem:[#allocation7 + $0x78] sm:$0xff]  ;;  %v166_v9 = vld [vmem:[#allocation7 + $0x70] sm:$0xff]  ;;  %v81_v10 = vld [vmem:[#allocation5 + $0x48] sm:$0xff] }
  0x13   :  { %217 = vmatpush.msk.msra.mxu1 %vm100_vm0, %v88_v4  ;;  %236 = vmatpush.msra.mxu2 %v167_v7  ;;  %v165_v11 = vld [vmem:[#allocation7 + $0x68] sm:$0xff]  ;;  %v80_v12 = vld [vmem:[#allocation5 + $0x40] sm:$0xff]  ;;  %v71_v13 = vld [vmem:[#allocation2 + $0x18] sm:$0xff] }
  0x14   :  { %106 = vmatpush.msra.mxu0 %v85_v2  ;;  %222 = vmatpush.msra.mxu3 %v85_v2  ;;  %v164_v14 = vld [vmem:[#allocation7 + $0x60] sm:$0xff]  ;;  %v79_v15 = vld [vmem:[#allocation5 + $0x38] sm:$0xff]  ;;  %v163_v16 = vld [vmem:[#allocation7 + $0x58] sm:$0xff] }
  0x15   :  { %218 = vmatmul.msk.f32.vlgmr.msra.gmra.mxu1 %vm93_vm1, %v69_v6  ;;  %237 = vmatpush.msra.mxu2 %v166_v9  ;;  %v78_v17 = vld [vmem:[#allocation5 + $0x30] sm:$0xff]  ;;  %v162_v18 = vld [vmem:[#allocation7 + $0x50] sm:$0xff]  ;;  %v77_v19 = vld [vmem:[#allocation5 + $0x28] sm:$0xff] }
  0x16   :  { %107 = vmatpush.msra.mxu0 %v84_v3  ;;  %223 = vmatpush.msra.mxu3 %v84_v3  ;;  %v161_v20 = vld [vmem:[#allocation7 + $0x48] sm:$0xff]  ;;  %v76_v21 = vld [vmem:[#allocation5 + $0x20] sm:$0xff]  ;;  %v160_v22 = vld [vmem:[#allocation7 + $0x40] sm:$0xff] }
  0x17   :  { %172 = vmatpush.msrb.mxu1 %v167_v7  ;;  %238 = vmatpush.msra.mxu2 %v165_v11  ;;  %v75_v23 = vld [vmem:[#allocation5 + $0x18] sm:$0xff]  ;;  %v159_v24 = vld [vmem:[#allocation7 + $0x38] sm:$0xff]  ;;  %v74_v25 = vld [vmem:[#allocation5 + $0x10] sm:$0xff] }
  0x18   :  { %108 = vmatpush.msra.mxu0 %v83_v5  ;;  %224 = vmatpush.msra.mxu3 %v83_v5  ;;  %v158_v26 = vld [vmem:[#allocation7 + $0x30] sm:$0xff]  ;;  %v73_v27 = vld [vmem:[#allocation5 + $0x8] sm:$0xff]  ;;  %v157_v28 = vld [vmem:[#allocation7 + $0x28] sm:$0xff] }
  0x19   :  { %173 = vmatpush.msrb.mxu1 %v166_v9  ;;  %239 = vmatpush.msra.mxu2 %v164_v14  ;;  %v72_v29 = vld [vmem:[#allocation5] sm:$0xff]  ;;  %v70_v31 = vld [vmem:[#allocation2 + $0x10] sm:$0xff]  ;;  %v156_v32 = vld [vmem:[#allocation7 + $0x20] sm:$0xff] }
  0x1a   :  { %109 = vmatpush.msra.mxu0 %v82_v8  ;;  %225 = vmatpush.msra.mxu3 %v82_v8  ;;  %v68_v30 = vld [vmem:[#allocation2] sm:$0xff]  ;;  %v154_v34 = vld [vmem:[#allocation7 + $0x10] sm:$0xff]  ;;  %v153_v35 = vld [vmem:[#allocation7 + $0x8] sm:$0xff] }
  0x1b   :  { %174 = vmatpush.msrb.mxu1 %v165_v11  ;;  %240 = vmatpush.msra.mxu2 %v163_v16  ;;  %v155_v33 = vld [vmem:[#allocation7 + $0x18] sm:$0xff]  ;;  %v152_v36 = vld [vmem:[#allocation7] sm:$0xff] }
  0x1c   :  { %110 = vmatpush.msra.mxu0 %v81_v10  ;;  %226 = vmatpush.msra.mxu3 %v81_v10  ;;  %v260_v38 = vld [vmem:[%s433_s2] ss:$0 sm:$0xff]  ;;  %s201_s2 = sshll.u32 %s371_s13, 4  ;;  %s202_s2 = int_to_ptr.vmem [resolvable:$true] %s201_s2 }
  0x1d   :  { %219 = vmatmul.msk.f32.gmra.mxu1 %vm93_vm1, %v71_v13  ;;  %241 = vmatpush.msra.mxu2 %v162_v18  ;;  %v261_v48 = vld [vmem:[%s435_s4] ss:$0 sm:$0xff] }
  0x1e   :  { %111 = vmatpush.msra.mxu0 %v80_v12  ;;  %227 = vmatpush.msra.mxu3 %v80_v12 }
  0x1f   :  { %175 = vmatpush.msrb.mxu1 %v164_v14  ;;  %242 = vmatpush.msra.mxu2 %v161_v20 }
  0x20   :  { %112 = vmatpush.msra.mxu0 %v79_v15  ;;  %228 = vmatpush.msra.mxu3 %v79_v15 }
  0x21   :  { %176 = vmatpush.msrb.mxu1 %v163_v16  ;;  %243 = vmatpush.msra.mxu2 %v160_v22 }
  0x22   :  { %113 = vmatpush.msra.mxu0 %v78_v17  ;;  %229 = vmatpush.msra.mxu3 %v78_v17 }
  0x23   :  { %177 = vmatpush.msrb.mxu1 %v162_v18  ;;  %244 = vmatpush.msra.mxu2 %v159_v24 }
  0x24   :  { %114 = vmatpush.msra.mxu0 %v77_v19  ;;  %230 = vmatpush.msra.mxu3 %v77_v19 }
  0x25   :  { %178 = vmatpush.msrb.mxu1 %v161_v20  ;;  %245 = vmatpush.msra.mxu2 %v158_v26 }
  0x26   :  { %115 = vmatpush.msra.mxu0 %v76_v21  ;;  %231 = vmatpush.msra.mxu3 %v76_v21 }
  0x27   :  { %179 = vmatpush.msrb.mxu1 %v160_v22  ;;  %246 = vmatpush.msra.mxu2 %v157_v28 }
  0x28   :  { %116 = vmatpush.msra.mxu0 %v75_v23  ;;  %232 = vmatpush.msra.mxu3 %v75_v23 }
  0x29   :  { %180 = vmatpush.msrb.mxu1 %v159_v24  ;;  %247 = vmatpush.msra.mxu2 %v156_v32 }
  0x2a   :  { %117 = vmatpush.msra.mxu0 %v74_v25  ;;  %233 = vmatpush.msra.mxu3 %v74_v25 }
  0x2b   :  { %181 = vmatpush.msrb.mxu1 %v158_v26  ;;  %248 = vmatpush.msra.mxu2 %v155_v33 }
  0x2c   :  { %118 = vmatpush.msra.mxu0 %v73_v27  ;;  %234 = vmatpush.msra.mxu3 %v73_v27 }
  0x2d   :  { %182 = vmatpush.msrb.mxu1 %v157_v28  ;;  %249 = vmatpush.msra.mxu2 %v154_v34 }
  0x2e   :  { %119 = vmatpush.msra.mxu0 %v72_v29  ;;  %235 = vmatpush.msra.mxu3 %v72_v29 }
  0x2f   :  { %120 = vmatmul.f32.vlgmr.msra.gmra.mxu0 %v68_v30  ;;  %123 = vmatmul.f32.vlgmr.msra.gmra.mxu3 %v70_v31 }
  0x30   :  { %183 = vmatpush.msrb.mxu1 %v156_v32  ;;  %250 = vmatpush.msra.mxu2 %v153_v35 }
  0x32   :  { %184 = vmatpush.msrb.mxu1 %v155_v33  ;;  %251 = vmatpush.msra.mxu2 %v152_v36 }
  0x34   :  { %185 = vmatpush.msrb.mxu1 %v154_v34 }
  0x36   :  { %186 = vmatpush.msrb.mxu1 %v153_v35 }
  0x38   :  { %187 = vmatpush.msrb.mxu1 %v152_v36 }
  0x92   :  { %v144_v37 = vpop.f32.mrf.mxu1 }
  0x9a   :  { %v147_v44 = vpop.f32.mrf.mxu1 }
  0xac   :  { %v121_v39 = vpop.f32.mrf.mxu0 }
  0xad   :  { %v122_v40 = vadd.f32 %v260_v38, %v121_v39 }
  0xaf   :  { %v145_v41 = vadd.f32 %v144_v37, %v122_v40 }
  0xb1   :  { %v150_v42 = vmax.f32 %v145_v41, 0.0 }
  0xb2   :  { %v124_v43 = vpop.f32.mrf.mxu3 }
  0xb3   :  { %v125_v45 = vadd.f32 %v260_v38, %v124_v43  ;;  %188 = vmatmul.f32.vlgmr.msrb.gmra.mxu1 %v150_v42 }
  0xb5   :  { %v148_v46 = vadd.f32 %v147_v44, %v125_v45 }
  0xb7   :  { %v151_v47 = vmax.f32 %v148_v46, 0.0 }
  0xb9   :  { %191 = vmatmul.f32.vlgmr.msra.gmra.mxu2 %v151_v47 }
 0x130   :  { %v189_v49 = vpop.f32.mrf.mxu1 }
 0x131   :  { %v190_v50 = vadd.f32 %v261_v48, %v189_v49 }
 0x133   :  { %195 = vst [vmem:[#allocation8] sm:$0xff] %v190_v50 }
 0x13c   :  { %v192_v51 = vpop.f32.mrf.mxu2 }
 0x13d   :  { %v193_v52 = vadd.f32 %v261_v48, %v192_v51 }
 0x13f   :  { %196 = vst [vmem:[#allocation8 + $0x8] sm:$0xff] %v193_v52 }
 0x140   :  { %209 = dma.vmem_to_hbm [thread:$0]  %s202_s2, 256, %s204_s16, [#allocation4], %s365_s26, %s365_s26, %s366_s27  }
 0x141   :  { %362 = dma.done.wait [#allocation4], 256  }
 0x142   :  { %363 = vsyncadd [#allocation4], 4294967040 }
 0x143   :  { %214 = vsyncpa [#allocation3], 1 }
 0x144   :  { %215 = vsyncpa [#allocation6], 1 }
 0x145   :  { %216 = vsyncpa [#allocation4], 1 }

</bundles_post_ra>
